<compile_context>
chip_gen: v5e
topology: v5e:2x2
jax: 0.10.0
libtpu: 0.0.40
codegen_flags: <defaults>
</compile_context>

<pallas_src>
import jax
import jax.numpy as jnp
from jax.experimental import pallas as pl
from jax.experimental.pallas import tpu as pltpu


def _vmem_limits():
    """Generation-aware VMEM numbers: (vmem_limit_bytes, tile_budget_bytes)."""
    default_cap = 64 * 1024 * 1024
    try:
        cap = getattr(pltpu.get_tpu_info(), "vmem_capacity_bytes", None) or default_cap
    except Exception:  # non-TPU tracing / interpret mode
        cap = default_cap
    # Leave headroom for compiler scratch; stays well under physical VMEM.
    vmem_limit = min((cap * 3) // 4, 100 * 1024 * 1024)  # ~96 MiB v5e/v6e, ~48 MiB v7x
    tile_budget = (vmem_limit * 3) // 4                   # ~72 MiB / ~36 MiB
    return int(vmem_limit), int(tile_budget)


def _choose_tiles(B, V, W, L, itemsize, budget):
    """Pick (b_tile, l_tile) for (b_tile, V, l_tile) x resident A^T -> (b_tile, W, l_tile)."""
    # Lane axis of every block: full L when L < 128, else a multiple of 128.
    l_tile = L if L < 128 else 128 * min(L // 128, 4)
    # VMEM bytes one batch row of a block costs:
    #   double-buffered input + output pipeline blocks (native dtype)
    #   + in-kernel f32 temporaries (f32 matmul result, upcast x, broadcast A^T row).
    per_b = itemsize * 2 * (V + W) * l_tile + 4 * ((V + W) * l_tile + V * W)
    fixed = 2 * V * W * itemsize  # resident A^T block (counted conservatively)
    b_tile = max(1, (budget - fixed) // per_b)
    # TODO(synk): on v7x (2 TensorCores) cap b_tile so the b-grid has an even number
    # of >= 2 steps; on single-TC v5e/v6e keeping one big step is strictly better.
    return int(min(b_tile, B, 8192)), int(l_tile)


def nconv_kernel(x_ref, at_ref, o_ref):
    # x_ref : (b_tile, V, l_tile)  activation block in its natural (B, V, L) layout
    # at_ref: (W, V)               A^T, VMEM-resident across all grid steps
    # o_ref : (b_tile, W, l_tile)  output block written straight into (B, W, L)
    b_tile = x_ref.shape[0]
    # Batched MXU contraction (same structure as flash-attention's 'bqk,bkd->bqd'):
    #   out[b, w, l] = sum_v A^T[w, v] * x[b, v, l]
    at_b = jnp.broadcast_to(at_ref[...][None], (b_tile,) + at_ref.shape)
    o_ref[...] = jnp.einsum(
        "bwv,bvl->bwl", at_b, x_ref[...], preferred_element_type=jnp.float32
    ).astype(o_ref.dtype)
    # TODO(synk): for very large V*W the broadcast of A^T costs b_tile VMEM copies;
    # switch to an in-kernel (b,l,V) relayout + flat 2-D matmul (XLU is idle here),
    # and K-tile V over an 'arbitrary' grid axis with an f32 accumulator.


def nconv(x, A):
    """x: (N, C, V, L), A: (V, W) -> (N, C, W, L)  (== einsum('ncvl,vw->ncwl'))."""
    N, C, V, L = x.shape
    V2, W = A.shape
    assert V == V2, "contraction dim mismatch"
    dtype = x.dtype
    itemsize = jnp.dtype(dtype).itemsize

    B = N * C
    x3 = x.reshape(B, V, L)        # metadata-only: merge leading axes
    at = jnp.swapaxes(A, 0, 1)     # (W, V); tiny, negligible HBM traffic

    vmem_limit, budget = _vmem_limits()
    b_tile, l_tile = _choose_tiles(B, V, W, L, itemsize, budget)
    grid = (pl.cdiv(B, b_tile), pl.cdiv(L, l_tile))

    out3 = pl.pallas_call(
        nconv_kernel,
        out_shape=jax.ShapeDtypeStruct((B, W, L), dtype),
        grid_spec=pltpu.PrefetchScalarGridSpec(
            num_scalar_prefetch=0,
            grid=grid,
            in_specs=[
                pl.BlockSpec((b_tile, V, l_tile), lambda b, l: (b, 0, l)),  # streamed x
                pl.BlockSpec((W, V), lambda b, l: (0, 0)),                  # resident A^T
            ],
            out_specs=pl.BlockSpec((b_tile, W, l_tile), lambda b, l: (b, 0, l)),
        ),
        compiler_params=pltpu.CompilerParams(
            dimension_semantics=("parallel", "parallel"),
            vmem_limit_bytes=vmem_limit,
        ),
    )(x3, at)

    return out3.reshape(N, C, W, L)  # metadata-only split of the leading axis


if __name__ == "__main__":
    key = jax.random.PRNGKey(0)
    kx, ka = jax.random.split(key)

    N, C, V, L = 2, 4, 16, 16
    W = V  # square adjacency, as in the graph-conv use of this op

    x = jax.random.normal(kx, (N, C, V, L), dtype=jnp.float32)
    A = jax.random.normal(ka, (V, W), dtype=jnp.float32)

    out = jax.jit(nconv)(x, A)
    out = jax.block_until_ready(out)

    # Correctness check against plain-JAX einsum reference.
    ref = jnp.einsum("ncvl,vw->ncwl", x, A)
    assert out.shape == ref.shape == (N, C, W, L)
    assert jnp.allclose(out, ref, atol=1e-4, rtol=1e-4)

    print("KERNEL_OK")
</pallas_src>

<mosaic_0001>
module attributes {stable_mosaic.version = 11 : i64} {
  func.func @nconv_kernel(%arg0: i32, %arg1: i32, %arg2: memref<8x16x16xf32, #tpu.memory_space<vmem>>, %arg3: memref<16x16xf32, #tpu.memory_space<vmem>>, %arg4: memref<8x16x16xf32, #tpu.memory_space<vmem>>) attributes {dimension_semantics = [#tpu.dimension_semantics<parallel>, #tpu.dimension_semantics<parallel>], iteration_bounds = array<i64: 1, 1>, scalar_prefetch = 0 : i64, scratch_operands = 0 : i64, tpu.core_type = #tpu.core_type<tc>, window_params = [{transform_indices = @transform_0, window_bounds = array<i64: 8, 16, 16>}, {pipeline_mode = #tpu.pipeline_mode<synchronous>, transform_indices = @transform_1, window_bounds = array<i64: 16, 16>}, {transform_indices = @transform_2, window_bounds = array<i64: 8, 16, 16>}]} {
    %c0 = arith.constant 0 : index
    %c0_0 = arith.constant 0 : index
    %0 = vector.load %arg3[%c0, %c0_0] : memref<16x16xf32, #tpu.memory_space<vmem>>, vector<16x16xf32>
    %1 = vector.shape_cast %0 : vector<16x16xf32> to vector<1x16x16xf32>
    %2 = vector.shape_cast %1 : vector<1x16x16xf32> to vector<1x16x16xf32>
    %3 = vector.broadcast %2 : vector<1x16x16xf32> to vector<8x16x16xf32>
    %c0_1 = arith.constant 0 : index
    %c0_2 = arith.constant 0 : index
    %c0_3 = arith.constant 0 : index
    %4 = vector.load %arg2[%c0_1, %c0_2, %c0_3] : memref<8x16x16xf32, #tpu.memory_space<vmem>>, vector<8x16x16xf32>
    "tpu.trace_start"() <{level = 10 : i32, message = "bwv,bvl->bwl"}> : () -> ()
    %cst = arith.constant dense<0.000000e+00> : vector<8x16x16xf32>
    %5 = tpu.matmul %3, %4, %cst {dimension_numbers = #tpu.dot_dimension_numbers<[2], [1], [1], [2], [0, 0, 0, 1, 1, 2], [0], [0]>} : vector<8x16x16xf32>, vector<8x16x16xf32>, vector<8x16x16xf32> -> vector<8x16x16xf32>
    "tpu.trace_stop"() : () -> ()
    %c0_4 = arith.constant 0 : index
    %c0_5 = arith.constant 0 : index
    %c0_6 = arith.constant 0 : index
    %6 = vector.load %arg4[%c0_4, %c0_5, %c0_6] : memref<8x16x16xf32, #tpu.memory_space<vmem>>, vector<8x16x16xf32>
    tpu.vector_store %arg4[%c0_4, %c0_5, %c0_6], %5 {strides = array<i32>} : memref<8x16x16xf32, #tpu.memory_space<vmem>>, vector<8x16x16xf32>,
    return
  }
  func.func @transform_0(%arg0: i32, %arg1: i32) -> (i32, i32, i32) {
    %c0_i32 = arith.constant 0 : i32
    %c0_i32_0 = arith.constant 0 : i32
    return %arg0, %c0_i32, %arg1 : i32, i32, i32
  }
  func.func @transform_1(%arg0: i32, %arg1: i32) -> (i32, i32) {
    %c0_i32 = arith.constant 0 : i32
    %c0_i32_0 = arith.constant 0 : i32
    %c0_i32_1 = arith.constant 0 : i32
    return %c0_i32, %c0_i32_0 : i32, i32
  }
  func.func @transform_2(%arg0: i32, %arg1: i32) -> (i32, i32, i32) {
    %c0_i32 = arith.constant 0 : i32
    %c0_i32_0 = arith.constant 0 : i32
    return %arg0, %c0_i32, %arg1 : i32, i32, i32
  }
}

</mosaic_0001>

<bundles_post_ra>
// kernel: nconv.1
= control target key start
LH: loop header
LB: loop body
LE: loop exit
PB: predicated region body
PF: predicated region fallthrough
CT: control target
= control target key end

     0   :  { %7 = vsyncpa [#allocation3], 0  ;;  %s413_s0 = inlined_call_operand.hbm [shape: f32[8,16,16], index: 0, kind: input, shape index: {}]   ;;  %s414_s1 = inlined_call_operand.vmem [shape: f32[16,16], index: 1, kind: input, shape index: {}]   ;;  %s415_s2 = inlined_call_operand.hbm [shape: f32[8,16,16], index: 2, kind: output, shape index: {}]  }
   0x1   :  { %8 = vsyncpa [#allocation4], 0  ;;  %s13_s11 = sshll.u32 %s413_s0, 4  ;;  %s344_s12 = smov [#allocation2]   ;;  %s14_s11 = int_to_ptr.hbm [resolvable:$true] %s13_s11 }
   0x2   :  { %s15_s13 = sshll.u32 %s344_s12, 4  ;;  %s345_s14 = smov 128   ;;  %s16_s13 = int_to_ptr.vmem [resolvable:$true] %s15_s13 }
   0x3   :  { %s346_s15 = smov 8  }
   0x4   :  { %21 = dma.hbm_to_vmem [thread:$0]  %s14_s11, 2048, %s16_s13, [#allocation3], %s345_s14, %s345_s14, %s346_s15  }
   0x5   :  { %340 = dma.done.wait [#allocation3], 2048  }
   0x6   :  { %341 = vsyncadd [#allocation3], 4294965248  ;;  %v35_v0 = vld [vmem:[#allocation2 + $0x28] sm:$0xff]  ;;  %v37_v1 = vld [vmem:[#allocation2 + $0x38] sm:$0xff]  ;;  %vm46_vm0 = vcmask 130048   ;;  %s259_s22 = sshll.u32 %s415_s2, 4  ;;  %s260_s22 = int_to_ptr.hbm [resolvable:$true] %s259_s22 }
   0x7   :  { %v34_v2 = vld [vmem:[#allocation2 + $0x20] sm:$0xff]  ;;  %113 = vmatpush.msra.mxu2 %v35_v0  ;;  %136 = vmatpush.msra.mxu3 %v37_v1  ;;  %v36_v3 = vld [vmem:[#allocation2 + $0x30] sm:$0xff]  ;;  %v43_v5 = vld [vmem:[#allocation2 + $0x68] sm:$0xff] }
   0x8   :  { %v28_v4 = vld [vmem:[%s414_s1] sm:$0xff]  ;;  %v45_v6 = vld [vmem:[#allocation2 + $0x78] sm:$0xff]  ;;  %v31_v7 = vld [vmem:[#allocation2 + $0x8] sm:$0xff] }
   0x9   :  { %114 = vmatpush.msra.mxu2 %v34_v2  ;;  %137 = vmatpush.msra.mxu3 %v36_v3  ;;  %v33_v8 = vld [vmem:[#allocation2 + $0x18] sm:$0xff]  ;;  %v42_v9 = vld [vmem:[#allocation2 + $0x60] sm:$0xff]  ;;  %v32_v11 = vld [vmem:[#allocation2 + $0x10] sm:$0xff] }
   0xa   :  { %276 = vmatmul.msk.f32.vlgmr.msra.gmra.mxu2 %vm46_vm0, %v28_v4  ;;  %278 = vmatmul.msk.f32.vlgmr.msra.gmra.mxu3 %vm46_vm0, %v28_v4  ;;  %v30_v10 = vld [vmem:[#allocation2] sm:$0xff]  ;;  %v44_v12 = vld [vmem:[#allocation2 + $0x70] sm:$0xff]  ;;  %v39_v13 = vld [vmem:[#allocation2 + $0x48] sm:$0xff] }
   0xb   :  { %205 = vmatpush.msrb.mxu2 %v43_v5  ;;  %228 = vmatpush.msrb.mxu3 %v45_v6  ;;  %v41_v14 = vld [vmem:[#allocation2 + $0x58] sm:$0xff]  ;;  %v29_v15 = vld [vmem:[%s414_s1 + $0x8] sm:$0xff]  ;;  %v38_v16 = vld [vmem:[#allocation2 + $0x40] sm:$0xff]  ;;  %s347_s1 = smov [#allocation5]  }
   0xc   :  { %67 = vmatpush.msra.mxu0 %v31_v7  ;;  %90 = vmatpush.msra.mxu1 %v33_v8  ;;  %v40_v17 = vld [vmem:[#allocation2 + $0x50] sm:$0xff]  ;;  %s257_s19 = sshll.u32 %s347_s1, 4  ;;  %s258_s19 = int_to_ptr.vmem [resolvable:$true] %s257_s19 }
   0xd   :  { %206 = vmatpush.msrb.mxu2 %v42_v9  ;;  %229 = vmatpush.msrb.mxu3 %v44_v12 }
   0xe   :  { %68 = vmatpush.msra.mxu0 %v30_v10  ;;  %91 = vmatpush.msra.mxu1 %v32_v11 }
   0xf   :  { %272 = vmatmul.msk.f32.vlgmr.msra.gmra.mxu0 %vm46_vm0, %v28_v4  ;;  %274 = vmatmul.msk.f32.vlgmr.msra.gmra.mxu1 %vm46_vm0, %v28_v4 }
  0x10   :  { %159 = vmatpush.msrb.mxu0 %v39_v13  ;;  %182 = vmatpush.msrb.mxu1 %v41_v14 }
  0x12   :  { %277 = vmatmul.msk.f32.gmra.mxu2 %vm46_vm0, %v29_v15  ;;  %279 = vmatmul.msk.f32.gmra.mxu3 %vm46_vm0, %v29_v15 }
  0x13   :  { %160 = vmatpush.msrb.mxu0 %v38_v16  ;;  %183 = vmatpush.msrb.mxu1 %v40_v17 }
  0x17   :  { %273 = vmatmul.msk.f32.gmra.mxu0 %vm46_vm0, %v29_v15  ;;  %275 = vmatmul.msk.f32.gmra.mxu1 %vm46_vm0, %v29_v15 }
  0x1a   :  { %284 = vmatmul.msk.f32.vlgmr.msrb.gmra.mxu2 %vm46_vm0, %v28_v4  ;;  %286 = vmatmul.msk.f32.vlgmr.msrb.gmra.mxu3 %vm46_vm0, %v28_v4 }
  0x1f   :  { %280 = vmatmul.msk.f32.vlgmr.msrb.gmra.mxu0 %vm46_vm0, %v28_v4  ;;  %282 = vmatmul.msk.f32.vlgmr.msrb.gmra.mxu1 %vm46_vm0, %v28_v4 }
  0x22   :  { %285 = vmatmul.msk.f32.gmra.mxu2 %vm46_vm0, %v29_v15  ;;  %287 = vmatmul.msk.f32.gmra.mxu3 %vm46_vm0, %v29_v15 }
  0x27   :  { %281 = vmatmul.msk.f32.gmra.mxu0 %vm46_vm0, %v29_v15  ;;  %283 = vmatmul.msk.f32.gmra.mxu1 %vm46_vm0, %v29_v15 }
  0x8c   :  { %v70_v18 = vpop.f32.mrf.mxu0  ;;  %v93_v19 = vpop.f32.mrf.mxu1 }
  0x8d   :  { %237 = vst.msk [vmem:[#allocation5] sm:$0xff] %vm46_vm0, %v70_v18  ;;  %v116_v20 = vpop.f32.mrf.mxu2  ;;  %v139_v21 = vpop.f32.mrf.mxu3 }
  0x8e   :  { %239 = vst.msk [vmem:[#allocation5 + $0x10] sm:$0xff] %vm46_vm0, %v93_v19 }
  0x8f   :  { %241 = vst.msk [vmem:[#allocation5 + $0x20] sm:$0xff] %vm46_vm0, %v116_v20 }
  0x90   :  { %243 = vst.msk [vmem:[#allocation5 + $0x30] sm:$0xff] %vm46_vm0, %v139_v21 }
  0x94   :  { %v73_v22 = vpop.f32.mrf.mxu0  ;;  %v96_v23 = vpop.f32.mrf.mxu1 }
  0x95   :  { %238 = vst.msk [vmem:[#allocation5 + $0x8] sm:$0xff] %vm46_vm0, %v73_v22  ;;  %v119_v24 = vpop.f32.mrf.mxu2  ;;  %v142_v25 = vpop.f32.mrf.mxu3 }
  0x96   :  { %240 = vst.msk [vmem:[#allocation5 + $0x18] sm:$0xff] %vm46_vm0, %v96_v23 }
  0x97   :  { %242 = vst.msk [vmem:[#allocation5 + $0x28] sm:$0xff] %vm46_vm0, %v119_v24 }
  0x98   :  { %244 = vst.msk [vmem:[#allocation5 + $0x38] sm:$0xff] %vm46_vm0, %v142_v25 }
  0x9c   :  { %v162_v26 = vpop.f32.mrf.mxu0  ;;  %v185_v27 = vpop.f32.mrf.mxu1 }
  0x9d   :  { %245 = vst.msk [vmem:[#allocation5 + $0x40] sm:$0xff] %vm46_vm0, %v162_v26  ;;  %v208_v28 = vpop.f32.mrf.mxu2  ;;  %v231_v29 = vpop.f32.mrf.mxu3 }
  0x9e   :  { %247 = vst.msk [vmem:[#allocation5 + $0x50] sm:$0xff] %vm46_vm0, %v185_v27 }
  0x9f   :  { %249 = vst.msk [vmem:[#allocation5 + $0x60] sm:$0xff] %vm46_vm0, %v208_v28 }
  0xa0   :  { %251 = vst.msk [vmem:[#allocation5 + $0x70] sm:$0xff] %vm46_vm0, %v231_v29 }
  0xa4   :  { %v165_v30 = vpop.f32.mrf.mxu0  ;;  %v188_v31 = vpop.f32.mrf.mxu1 }
  0xa5   :  { %246 = vst.msk [vmem:[#allocation5 + $0x48] sm:$0xff] %vm46_vm0, %v165_v30  ;;  %v211_v32 = vpop.f32.mrf.mxu2  ;;  %v234_v33 = vpop.f32.mrf.mxu3 }
  0xa6   :  { %248 = vst.msk [vmem:[#allocation5 + $0x58] sm:$0xff] %vm46_vm0, %v188_v31 }
  0xa7   :  { %250 = vst.msk [vmem:[#allocation5 + $0x68] sm:$0xff] %vm46_vm0, %v211_v32 }
  0xa8   :  { %252 = vst.msk [vmem:[#allocation5 + $0x78] sm:$0xff] %vm46_vm0, %v234_v33 }
  0xa9   :  { %265 = dma.vmem_to_hbm [thread:$0]  %s258_s19, 2048, %s260_s22, [#allocation4], %s345_s14, %s345_s14, %s346_s15  }
  0xaa   :  { %342 = dma.done.wait [#allocation4], 2048  }
  0xab   :  { %343 = vsyncadd [#allocation4], 4294965248 }
  0xac   :  { %270 = vsyncpa [#allocation3], 1 }
  0xad   :  { %271 = vsyncpa [#allocation4], 1 }

</bundles_post_ra>
